<compile_context>
chip_gen: v7x
topology: tpu7x:2x2x1
jax: 0.10.0
libtpu: 0.0.40
codegen_flags: <defaults>
</compile_context>

<pallas_src>
import functools

import jax
import jax.numpy as jnp
from jax.experimental import pallas as pl
from jax.experimental.pallas import tpu as pltpu


def _round_up(x, m):
    return ((x + m - 1) // m) * m


def _tpu_caps():
    """(two_tensorcores_per_chip, physical VMEM bytes per core)."""
    kind = ""
    try:
        kind = (getattr(jax.devices()[0], "device_kind", "") or "").lower()
    except Exception:
        pass
    two_tc = "v7" in kind
    vmem_phys = (64 << 20) if two_tc else (128 << 20)
    try:
        vmem_phys = int(pltpu.get_tpu_info().vmem_capacity_bytes)
    except Exception:
        pass
    return two_tc, vmem_phys


def _gap_kernel_single(x_ref, o_ref, *, inv_hw):
    """Single-step row mean: whole HW extent in one block."""
    o_ref[...] = (jnp.sum(x_ref[...], axis=-1, keepdims=True,
                          dtype=jnp.float32) * inv_hw).astype(o_ref.dtype)


def _gap_kernel_multi(x_ref, o_ref, acc_ref, *, inv_hw, hw, tk, need_mask):
    """Multi-step row mean over the lane axis (huge HW only).

    x_ref  : (TM, TK) input tile
    o_ref  : (TM, 1)  output, written once at the last reduction step
    acc_ref: (TM, 1)  f32 accumulator, persists across the HW grid axis
    """
    k = pl.program_id(1)

    @pl.when(k == 0)
    def _init():
        acc_ref[...] = jnp.zeros_like(acc_ref)

    x = x_ref[...]
    if need_mask:
        # Mask out-of-range lanes of the (partial) last lane tile; garbage
        # lanes would otherwise corrupt the sum.
        lane = jax.lax.broadcasted_iota(jnp.int32, x.shape, dimension=1)
        x = jnp.where((k * tk + lane) < hw, x, jnp.zeros_like(x))

    acc_ref[...] += jnp.sum(x, axis=-1, keepdims=True, dtype=jnp.float32)

    @pl.when(k == pl.num_programs(1) - 1)
    def _finalize():
        o_ref[...] = (acc_ref[...] * inv_hw).astype(o_ref.dtype)


def _choose_tiles(M, HW, itemsize, sublane, bytes_per_buf, two_tc):
    """Return (TM, TK); TK is None for the single-step (full-HW-block) path."""
    row_bytes = HW * itemsize
    m_pad = _round_up(M, sublane)

    if sublane * row_bytes <= bytes_per_buf:
        # Single reduction step: lane axis is full-extent (no lane padding).
        tm = (bytes_per_buf // row_bytes) // sublane * sublane
        tm = max(sublane, min(tm, m_pad))
        if two_tc and (M + tm - 1) // tm < 2 and m_pad > sublane:
            # Split rows across the two TensorCores only if each half still
            # issues a bandwidth-efficient DMA step.
            half = _round_up((M + 1) // 2, sublane)
            if half * row_bytes >= (2 << 20):
                tm = half
        return tm, None

    # Huge HW: multi-step reduction with a 128-multiple lane tile.
    tm = min(m_pad, 512)
    tk = (bytes_per_buf // (tm * itemsize)) // 128 * 128
    if tk < 128:
        tk = 128
        tm = max(sublane,
                 min(m_pad, (bytes_per_buf // (128 * itemsize)) // sublane * sublane))
    tk = min(tk, _round_up(HW, 128))
    return tm, tk


def global_avg_pool_2d(x, *, bytes_per_buf=None, vmem_limit=None):
    """x: (N, C, H, W) -> (N, C); mean over spatial dims.

    Matches torch: inputs.view(N, C, -1).mean(dim=2).
    """
    N, C, H, W = x.shape
    HW = H * W
    M = N * C

    out_dtype = x.dtype if jnp.issubdtype(x.dtype, jnp.floating) else jnp.float32
    itemsize = jnp.dtype(x.dtype).itemsize
    sublane = {1: 32, 2: 16}.get(itemsize, 8)

    two_tc, vmem_phys = _tpu_caps()
    if bytes_per_buf is None:
        bytes_per_buf = min(16 << 20, vmem_phys // 8)
    if vmem_limit is None:
        vmem_limit = min(96 << 20, (vmem_phys * 3) // 4)

    # Rows = N*C on the sublane axis, flattened spatial on the lane axis.
    x2 = x.reshape(M, HW)
    tm, tk = _choose_tiles(M, HW, itemsize, sublane, bytes_per_buf, two_tc)
    row_tiles = (M + tm - 1) // tm
    inv_hw = float(1.0 / HW)

    cost = pl.CostEstimate(
        flops=M * HW, transcendentals=0,
        bytes_accessed=M * HW * itemsize + M * jnp.dtype(out_dtype).itemsize)

    if tk is None:
        out = pl.pallas_call(
            functools.partial(_gap_kernel_single, inv_hw=inv_hw),
            out_shape=jax.ShapeDtypeStruct((M, 1), out_dtype),
            grid_spec=pltpu.PrefetchScalarGridSpec(
                num_scalar_prefetch=0,
                grid=(row_tiles,),
                in_specs=[pl.BlockSpec((tm, HW), lambda i: (i, 0))],
                out_specs=pl.BlockSpec((tm, 1), lambda i: (i, 0)),
            ),
            compiler_params=pltpu.CompilerParams(
                dimension_semantics=("parallel",),
                vmem_limit_bytes=vmem_limit,
            ),
            cost_estimate=cost,
        )(x2)
    else:
        k_tiles = (HW + tk - 1) // tk
        out = pl.pallas_call(
            functools.partial(_gap_kernel_multi, inv_hw=inv_hw, hw=HW, tk=tk,
                              need_mask=(HW % tk != 0)),
            out_shape=jax.ShapeDtypeStruct((M, 1), out_dtype),
            grid_spec=pltpu.PrefetchScalarGridSpec(
                num_scalar_prefetch=0,
                grid=(row_tiles, k_tiles),
                in_specs=[pl.BlockSpec((tm, tk), lambda i, k: (i, k))],
                out_specs=pl.BlockSpec((tm, 1), lambda i, k: (i, 0)),
                scratch_shapes=[pltpu.VMEM((tm, 1), jnp.float32)],
            ),
            compiler_params=pltpu.CompilerParams(
                dimension_semantics=("parallel", "arbitrary"),
                vmem_limit_bytes=vmem_limit,
            ),
            cost_estimate=cost,
        )(x2)

    return out[:, 0].reshape(N, C)


if __name__ == "__main__":
    key = jax.random.PRNGKey(0)

    # Small shape consistent with the module's GlobalAvgPool2d usage.
    N, C, H, W = 2, 4, 16, 16
    x = jax.random.normal(key, (N, C, H, W), dtype=jnp.float32)
    out = jax.block_until_ready(global_avg_pool_2d(x))
    ref = jnp.mean(x.reshape(N, C, -1), axis=2)
    assert out.shape == (N, C)
    assert jnp.allclose(out, ref, atol=1e-5, rtol=1e-5)

    # Larger shape: non-power-of-two HW, more rows (still single-step path,
    # no padding, lane axis full-extent).
    N2, C2, H2, W2 = 2, 16, 48, 48
    x2 = jax.random.normal(jax.random.PRNGKey(1), (N2, C2, H2, W2),
                           dtype=jnp.float32)
    out2 = jax.block_until_ready(global_avg_pool_2d(x2))
    ref2 = jnp.mean(x2.reshape(N2, C2, -1), axis=2)
    assert out2.shape == (N2, C2)
    assert jnp.allclose(out2, ref2, atol=1e-5, rtol=1e-5)

    # Force the multi-step reduction path with a tiny per-buffer budget to
    # exercise the masked partial last lane tile (HW=400 not a multiple of TK).
    N3, C3, H3, W3 = 1, 8, 20, 20
    x3 = jax.random.normal(jax.random.PRNGKey(2), (N3, C3, H3, W3),
                           dtype=jnp.float32)
    out3 = jax.block_until_ready(global_avg_pool_2d(x3, bytes_per_buf=8 << 10))
    ref3 = jnp.mean(x3.reshape(N3, C3, -1), axis=2)
    assert jnp.allclose(out3, ref3, atol=1e-5, rtol=1e-5)

    # bf16 input: sublane packing 16, f32 accumulation inside the kernel.
    x4 = jax.random.normal(jax.random.PRNGKey(3), (2, 16, 24, 24),
                           dtype=jnp.bfloat16)
    out4 = jax.block_until_ready(global_avg_pool_2d(x4))
    ref4 = jnp.mean(x4.reshape(2, 16, -1).astype(jnp.float32), axis=2)
    assert jnp.allclose(out4.astype(jnp.float32), ref4, atol=1e-2, rtol=2e-2)

    print("KERNEL_OK")
</pallas_src>

<mosaic_0001>
module attributes {stable_mosaic.version = 11 : i64} {
  func.func @_gap_kernel_single(%arg0: i32, %arg1: memref<8x256xf32, #tpu.memory_space<vmem>>, %arg2: memref<8x1xf32, #tpu.memory_space<vmem>>) attributes {dimension_semantics = [#tpu.dimension_semantics<parallel>], iteration_bounds = array<i64: 1>, scalar_prefetch = 0 : i64, scratch_operands = 0 : i64, tpu.core_type = #tpu.core_type<tc>, window_params = [{transform_indices = @transform_0, window_bounds = array<i64: 8, 256>}, {transform_indices = @transform_1, window_bounds = array<i64: 8, 1>}]} {
    %c0 = arith.constant 0 : index
    %c0_0 = arith.constant 0 : index
    %0 = vector.load %arg1[%c0, %c0_0] : memref<8x256xf32, #tpu.memory_space<vmem>>, vector<8x256xf32>
    %cst = arith.constant dense<0.000000e+00> : vector<8xf32>
    %1 = vector.multi_reduction <add>, %0, %cst [1] : vector<8x256xf32> to vector<8xf32>
    %2 = vector.shape_cast %1 : vector<8xf32> to vector<8x1xf32>
    %cst_1 = arith.constant 3.906250e-03 : f32
    %3 = vector.broadcast %cst_1 : f32 to vector<8x1xf32>
    %4 = arith.mulf %2, %3 : vector<8x1xf32>
    %c0_2 = arith.constant 0 : index
    %c0_3 = arith.constant 0 : index
    %5 = vector.load %arg2[%c0_2, %c0_3] : memref<8x1xf32, #tpu.memory_space<vmem>>, vector<8x1xf32>
    tpu.vector_store %arg2[%c0_2, %c0_3], %4 {strides = array<i32>} : memref<8x1xf32, #tpu.memory_space<vmem>>, vector<8x1xf32>,
    return
  }
  func.func @transform_0(%arg0: i32) -> (i32, i32) {
    %c0_i32 = arith.constant 0 : i32
    %c0_i32_0 = arith.constant 0 : i32
    return %arg0, %c0_i32 : i32, i32
  }
  func.func @transform_1(%arg0: i32) -> (i32, i32) {
    %c0_i32 = arith.constant 0 : i32
    %c0_i32_0 = arith.constant 0 : i32
    return %arg0, %c0_i32 : i32, i32
  }
}

</mosaic_0001>

<bundles_post_ra>
// kernel: tpu_custom_call.1
= control target key start
LH: loop header
LB: loop body
LE: loop exit
PB: predicated region body
PF: predicated region fallthrough
CT: control target
= control target key end

     0   :  { %6 = vsyncpa [#allocation3], 0  ;;  %s130_s0 = inlined_call_operand.hbm [shape: f32[8,256], index: 0, kind: input, shape index: {}]   ;;  %s131_s1 = inlined_call_operand.hbm [shape: f32[8,1], index: 1, kind: output, shape index: {}]  }
   0x1   :  { %7 = vsyncpa [#allocation4], 0  ;;  %s94_s6 = smov [#allocation2]   ;;  %s46_s10 = scalar_lea.hbm %s130_s0, 256 }
   0x2   :  { %s14_s7 = sshll.u32 %s94_s6, 4  ;;  %p47_p0 = scmp.ne.s32.totalorder %s130_s0, %s46_s10  ;;  %s15_s7 = int_to_ptr.vmem [resolvable:$true] %s14_s7 }
   0x3   :  { %p50_p1 = scmp.lt.u32.totalorder %s46_s10, %s130_s0 }
   0x5   :  { %p52_p2 = pnand %p50_p1, %p47_p0 }
   0x7   :  { %55 = shalt.err (!%p52_p2)
}
   0x8   :  { %s56_s15 = scalar_lea.vmem %s15_s7, 256  ;;  %p61_p4 = scmp.lt.s32.totalorder %s15_s7, %s15_s7 }
   0x9   :  { %p57_p3 = scmp.ne.s32.totalorder %s15_s7, %s56_s15  ;;  %p62_p5 = scmp.lt.s32.totalorder %s56_s15, %s56_s15 }
   0xb   :  { %p63_p6 = por %p62_p5, %p61_p4 }
   0xd   :  { %p64_p7 = pnand %p63_p6, %p57_p3 }
   0xf   :  { %67 = shalt.err (!%p64_p7)
}
  0x10   :  { %17 = dma.hbm_to_vmem [thread:$0]  %s130_s0, 256, %s15_s7, [#allocation3]  }
  0x11   :  { %90 = dma.done.wait [#allocation3], 256  }
  0x12   :  { %91 = vsyncadd [#allocation3], 4294967040  ;;  %v21_v0 = vld [vmem:[#allocation2] sm:$0xff]  ;;  %v22_v1 = vld [vmem:[#allocation2 + $0x8] sm:$0xff]  ;;  %s95_s18 = smov [#allocation5]   ;;  %vm27_vm0 = vcmask 7168  }
  0x13   :  { %v23_v2 = vadd.f32 %v22_v1, %v21_v0  ;;  %s35_s19 = sshll.u32 %s95_s18, 4  ;;  %s36_s19 = int_to_ptr.vmem [resolvable:$true] %s35_s19 }
  0x14   :  { %s68_s20 = scalar_lea.vmem %s36_s19, 128  ;;  %p73_p9 = scmp.lt.s32.totalorder %s36_s19, %s36_s19 }
  0x15   :  { %24 = vadd.xlane.f32.xlu0 %v23_v2  ;;  %p69_p8 = scmp.ne.s32.totalorder %s36_s19, %s68_s20  ;;  %p74_p10 = scmp.lt.s32.totalorder %s68_s20, %s68_s20 }
  0x17   :  { %p75_p11 = por %p74_p10, %p73_p9 }
  0x19   :  { %p76_p12 = pnand %p75_p11, %p69_p8 }
  0xa2   :  { %v25_v3 = vpop.xlane.xlu0 %24 }
  0xa3   :  { %v26_v4 = vmul.f32 0.00390625, %v25_v3 }
  0xa5   :  { %28 = vst.msk [vmem:[#allocation5] sm:$0xff] %vm27_vm0, %v26_v4 }
  0xa6   :  { %79 = shalt.err (!%p76_p12)
}
  0xa7   :  { %s80_s22 = scalar_lea.hbm %s131_s1, 128 }
  0xa8   :  { %p81_p13 = scmp.ne.s32.totalorder %s131_s1, %s80_s22  ;;  %p84_p0 = scmp.lt.u32.totalorder %s80_s22, %s131_s1 }
  0xaa   :  { %p86_p1 = pnand %p84_p0, %p81_p13 }
  0xac   :  { %89 = shalt.err (!%p86_p1)
}
  0xad   :  { %38 = dma.vmem_to_hbm [thread:$0]  %s36_s19, 128, %s131_s1, [#allocation4]  }
  0xae   :  { %92 = dma.done.wait [#allocation4], 128  }
  0xaf   :  { %93 = vsyncadd [#allocation4], 4294967168 }
  0xb0   :  { %42 = vsyncpa [#allocation3], 1 }
  0xb1   :  { %43 = vsyncpa [#allocation4], 1 }

</bundles_post_ra>
